<compile_context>
chip_gen: v7x
topology: tpu7x:2x2x1
jax: 0.10.0
libtpu: 0.0.40
codegen_flags: <defaults>
</compile_context>

<pallas_src>
import jax
import jax.numpy as jnp
from jax.experimental import pallas as pl
from jax.experimental.pallas import tpu as pltpu


def _round_up(x, m):
    return (x + m - 1) // m * m


def _masked_affine_kernel(z_ref, b_ref, w1_ref, b1_ref, w2_ref, b2_ref,
                          z_out_ref, logdet_ref):
    """One batch tile of the masked-affine coupling forward pass."""
    z = z_ref[...].astype(jnp.float32)            # (TN, D)
    bm = b_ref[...]                               # (1, D) f32 mask
    omb = 1.0 - bm
    zm = bm * z                                   # z_masked

    # Fused layer-1 of both nets: h = tanh(zm @ [W1s | W1t] + [b1s | b1t]).
    # One lane-dense (TN, 2H) MXU dot instead of two half-width ones.
    h = jnp.tanh(
        jnp.dot(zm.astype(w1_ref.dtype), w1_ref[...],
                preferred_element_type=jnp.float32)
        + b1_ref[...])

    # Fused block-diagonal layer-2:
    #   st = h @ [[W2s, 0], [0, W2t]] + [b2s | b2t]   -> (TN, 2D)
    # st[:, :D] = s(z_masked), st[:, D:] = t(z_masked).
    st = (jnp.dot(h.astype(w2_ref.dtype), w2_ref[...],
                  preferred_element_type=jnp.float32)
          + b2_ref[...])

    d = st.shape[1] // 2
    scale = st[:, :d]
    trans = st[:, d:]
    # torch.where(torch.isfinite(x), x, nan); abs(x) < inf == isfinite here.
    scale = jnp.where(jnp.abs(scale) < jnp.inf, scale, jnp.nan)
    trans = jnp.where(jnp.abs(trans) < jnp.inf, trans, jnp.nan)

    # Per-row log|det J|, written lane-dense as a (1, TN) row.
    ld = jnp.sum(omb * scale, axis=1, keepdims=True)        # (TN, 1)
    logdet_ref[...] = ld.T.astype(logdet_ref.dtype)          # (1, TN)

    # Recombine; fold trans first so fewer (TN, D) f32 temporaries stay live.
    acc = zm + omb * trans
    z_out_ref[...] = (acc + omb * (z * jnp.exp(scale))).astype(z_out_ref.dtype)


def _estimate_vmem_bytes(tn, d, h2, resident_bytes):
    # double-buffered f32 I/O tiles + VMEM-resident params + internal temporaries
    io = 2 * (tn * d * 4) + 2 * (tn * d * 4) + 2 * (tn * 4)
    temps = tn * h2 * 4 + tn * 2 * d * 4 + 4 * tn * d * 4
    return io + temps + resident_bytes


def masked_affine_flow(z, b, s_params, t_params, *, block_n=1024,
                       mxu_dtype=jnp.bfloat16):
    """MaskedAffineFlow forward. Returns (z_, log_det) with log_det shape (N,)."""
    n, d = z.shape
    w1s, b1s, w2s, b2s = s_params
    w1t, b1t, w2t, b2t = t_params
    h = w1s.shape[1]
    h2 = 2 * h

    # Fuse the two coupling nets in the wrapper:
    #   layer-1: (D, 2H)  = [W1s | W1t]        layer-2: (2H, 2D) = blockdiag(W2s, W2t)
    # MXU operands stored bf16 (native MXU rate everywhere); biases/mask in f32.
    w1_cat = jnp.concatenate([w1s, w1t], axis=1).astype(mxu_dtype)        # (D, 2H)
    b1_cat = jnp.concatenate([b1s, b1t]).reshape(1, h2).astype(jnp.float32)
    zhd = jnp.zeros((h, d), dtype=jnp.float32)
    w2_bd = jnp.concatenate(
        [jnp.concatenate([w2s, zhd], axis=1),
         jnp.concatenate([zhd, w2t], axis=1)], axis=0).astype(mxu_dtype)  # (2H, 2D)
    b2_cat = jnp.concatenate([b2s, b2t]).reshape(1, 2 * d).astype(jnp.float32)
    b2d = jnp.asarray(b).reshape(1, d).astype(jnp.float32)

    resident_bytes = sum(int(a.size) * a.dtype.itemsize
                         for a in (b2d, w1_cat, b1_cat, w2_bd, b2_cat))

    # Batch tile: large (kernel is HBM/per-step-overhead bound), multiple of 8
    # sublanes, capped so the estimated VMEM budget fits v7x's 64 MiB per core.
    tn = min(block_n, _round_up(n, 8))
    while tn > 8 and _estimate_vmem_bytes(tn, d, h2, resident_bytes) > (48 << 20):
        tn //= 2
    tn = max(8, _round_up(tn, 8))
    n_pad = _round_up(n, tn)
    z_p = z if n_pad == n else jnp.pad(z, ((0, n_pad - n), (0, 0)))
    grid = (n_pad // tn,)

    vmem_limit = int(min(max(1.25 * _estimate_vmem_bytes(tn, d, h2, resident_bytes),
                             32 << 20), 64 << 20))

    row_spec = pl.BlockSpec((tn, d), lambda i: (i, 0))

    def resident(shape):
        # Constant index map -> fetched once, stays VMEM-resident across the
        # grid; single buffer (no point double-buffering a constant block).
        return pl.BlockSpec(shape, lambda i: (0, 0), pipeline_mode=pl.Buffered(1))

    z_out, logdet = pl.pallas_call(
        _masked_affine_kernel,
        grid=grid,
        in_specs=[
            row_spec,                                     # z batch tile
            resident((1, d)),                             # mask b
            resident((d, h2)), resident((1, h2)),         # fused layer-1 W, b
            resident((h2, 2 * d)), resident((1, 2 * d)),  # fused layer-2 W, b
        ],
        out_specs=(
            row_spec,                                   # z_
            pl.BlockSpec((1, tn), lambda i: (0, i)),    # lane-dense log_det row
        ),
        out_shape=(
            jax.ShapeDtypeStruct((n_pad, d), z.dtype),
            jax.ShapeDtypeStruct((1, n_pad), jnp.float32),
        ),
        compiler_params=pltpu.CompilerParams(
            dimension_semantics=("parallel",),
            vmem_limit_bytes=vmem_limit),
    )(z_p, b2d, w1_cat, b1_cat, w2_bd, b2_cat)

    return z_out[:n], logdet[0, :n]


def _reference(z, b, s_params, t_params):
    w1s, b1s, w2s, b2s = s_params
    w1t, b1t, w2t, b2t = t_params
    z = z.astype(jnp.float32)
    bm = jnp.asarray(b).reshape(1, -1).astype(jnp.float32)
    zm = bm * z
    scale = jnp.tanh(zm @ w1s + b1s) @ w2s + b2s
    scale = jnp.where(jnp.isfinite(scale), scale, jnp.nan)
    trans = jnp.tanh(zm @ w1t + b1t) @ w2t + b2t
    trans = jnp.where(jnp.isfinite(trans), trans, jnp.nan)
    z_ = zm + (1.0 - bm) * (z * jnp.exp(scale) + trans)
    log_det = jnp.sum((1.0 - bm) * scale, axis=1)
    return z_, log_det


if __name__ == "__main__":
    key = jax.random.PRNGKey(0)
    batch, features, hidden = 16, 128, 64   # lane-dense D (multiple of 128)

    k = jax.random.split(key, 9)
    z = jax.random.normal(k[0], (batch, features), dtype=jnp.float32)
    # Alternating binary mask (AffineHalfFlow-style).
    b = (jnp.arange(features) % 2).astype(jnp.float32)

    def init_net(k1, k2):
        w1 = 0.1 * jax.random.normal(k1, (features, hidden), dtype=jnp.float32)
        b1 = jnp.zeros((hidden,), dtype=jnp.float32)
        w2 = 0.1 * jax.random.normal(k2, (hidden, features), dtype=jnp.float32)
        b2 = jnp.zeros((features,), dtype=jnp.float32)
        return (w1, b1, w2, b2)

    s_params = init_net(k[1], k[2])
    t_params = init_net(k[3], k[4])

    z_out, log_det = masked_affine_flow(z, b, s_params, t_params)
    jax.block_until_ready((z_out, log_det))

    z_ref, ld_ref = _reference(z, b, s_params, t_params)
    assert z_out.shape == (batch, features)
    assert log_det.shape == (batch,)
    # bf16 MXU operands vs. the pure-f32 reference -> loosened tolerances.
    assert jnp.allclose(z_out, z_ref, atol=5e-2, rtol=5e-2)
    assert jnp.allclose(log_det, ld_ref, atol=2e-1, rtol=5e-2)

    print("KERNEL_OK")
</pallas_src>

<mosaic_0001>
module attributes {stable_mosaic.version = 11 : i64} {
  func.func @_masked_affine_kernel(%arg0: i32, %arg1: memref<16x128xf32, #tpu.memory_space<vmem>>, %arg2: memref<1x128xf32, #tpu.memory_space<vmem>>, %arg3: memref<128x128xbf16, #tpu.memory_space<vmem>>, %arg4: memref<1x128xf32, #tpu.memory_space<vmem>>, %arg5: memref<128x256xbf16, #tpu.memory_space<vmem>>, %arg6: memref<1x256xf32, #tpu.memory_space<vmem>>, %arg7: memref<16x128xf32, #tpu.memory_space<vmem>>, %arg8: memref<1x16xf32, #tpu.memory_space<vmem>>) attributes {dimension_semantics = [#tpu.dimension_semantics<parallel>], iteration_bounds = array<i64: 1>, scalar_prefetch = 0 : i64, scratch_operands = 0 : i64, tpu.core_type = #tpu.core_type<tc>, window_params = [{transform_indices = @transform_0, window_bounds = array<i64: 16, 128>}, {pipeline_mode = #tpu.pipeline_mode<synchronous>, transform_indices = @transform_1, window_bounds = array<i64: 1, 128>}, {pipeline_mode = #tpu.pipeline_mode<synchronous>, transform_indices = @transform_2, window_bounds = array<i64: 128, 128>}, {pipeline_mode = #tpu.pipeline_mode<synchronous>, transform_indices = @transform_3, window_bounds = array<i64: 1, 128>}, {pipeline_mode = #tpu.pipeline_mode<synchronous>, transform_indices = @transform_4, window_bounds = array<i64: 128, 256>}, {pipeline_mode = #tpu.pipeline_mode<synchronous>, transform_indices = @transform_5, window_bounds = array<i64: 1, 256>}, {transform_indices = @transform_6, window_bounds = array<i64: 16, 128>}, {transform_indices = @transform_7, window_bounds = array<i64: 1, 16>}]} {
    %c0 = arith.constant 0 : index
    %c0_0 = arith.constant 0 : index
    %0 = vector.load %arg1[%c0, %c0_0] : memref<16x128xf32, #tpu.memory_space<vmem>>, vector<16x128xf32>
    %c0_1 = arith.constant 0 : index
    %c0_2 = arith.constant 0 : index
    %1 = vector.load %arg2[%c0_1, %c0_2] : memref<1x128xf32, #tpu.memory_space<vmem>>, vector<1x128xf32>
    %cst = arith.constant 1.000000e+00 : f32
    %2 = vector.broadcast %cst : f32 to vector<1x128xf32>
    %3 = arith.subf %2, %1 : vector<1x128xf32>
    %4 = vector.broadcast %1 : vector<1x128xf32> to vector<16x128xf32>
    %5 = arith.mulf %4, %0 : vector<16x128xf32>
    %6 = arith.truncf %5 : vector<16x128xf32> to vector<16x128xbf16>
    %c0_3 = arith.constant 0 : index
    %c0_4 = arith.constant 0 : index
    %7 = vector.load %arg3[%c0_3, %c0_4] : memref<128x128xbf16, #tpu.memory_space<vmem>>, vector<128x128xbf16>
    %cst_5 = arith.constant dense<0.000000e+00> : vector<16x128xf32>
    %8 = tpu.matmul %6, %7, %cst_5 {dimension_numbers = #tpu.dot_dimension_numbers<[1], [0], [0], [1], [0, 0, 1, 1], [], []>} : vector<16x128xbf16>, vector<128x128xbf16>, vector<16x128xf32> -> vector<16x128xf32>
    %c0_6 = arith.constant 0 : index
    %c0_7 = arith.constant 0 : index
    %9 = vector.load %arg4[%c0_6, %c0_7] : memref<1x128xf32, #tpu.memory_space<vmem>>, vector<1x128xf32>
    %10 = vector.broadcast %9 : vector<1x128xf32> to vector<16x128xf32>
    %11 = arith.addf %8, %10 : vector<16x128xf32>
    %12 = math.tanh %11 : vector<16x128xf32>
    %13 = arith.truncf %12 : vector<16x128xf32> to vector<16x128xbf16>
    %c0_8 = arith.constant 0 : index
    %c0_9 = arith.constant 0 : index
    %14 = vector.load %arg5[%c0_8, %c0_9] : memref<128x256xbf16, #tpu.memory_space<vmem>>, vector<128x256xbf16>
    %cst_10 = arith.constant dense<0.000000e+00> : vector<16x256xf32>
    %15 = tpu.matmul %13, %14, %cst_10 {dimension_numbers = #tpu.dot_dimension_numbers<[1], [0], [0], [1], [0, 0, 1, 1], [], []>} : vector<16x128xbf16>, vector<128x256xbf16>, vector<16x256xf32> -> vector<16x256xf32>
    %c0_11 = arith.constant 0 : index
    %c0_12 = arith.constant 0 : index
    %16 = vector.load %arg6[%c0_11, %c0_12] : memref<1x256xf32, #tpu.memory_space<vmem>>, vector<1x256xf32>
    %17 = vector.broadcast %16 : vector<1x256xf32> to vector<16x256xf32>
    %18 = arith.addf %15, %17 : vector<16x256xf32>
    %19 = vector.extract_strided_slice %18 {offsets = [0, 0], sizes = [16, 128], strides = [1, 1]} : vector<16x256xf32> to vector<16x128xf32>
    %20 = vector.extract_strided_slice %18 {offsets = [0, 128], sizes = [16, 128], strides = [1, 1]} : vector<16x256xf32> to vector<16x128xf32>
    %21 = math.absf %19 : vector<16x128xf32>
    %cst_13 = arith.constant 0x7F800000 : f32
    %22 = vector.broadcast %cst_13 : f32 to vector<16x128xf32>
    %23 = arith.cmpf olt, %21, %22 : vector<16x128xf32>
    %cst_14 = arith.constant 0x7FC00000 : f32
    %24 = vector.broadcast %cst_14 : f32 to vector<16x128xf32>
    %25 = arith.select %23, %19, %24 : vector<16x128xi1>, vector<16x128xf32>
    %26 = math.absf %20 : vector<16x128xf32>
    %cst_15 = arith.constant 0x7F800000 : f32
    %27 = vector.broadcast %cst_15 : f32 to vector<16x128xf32>
    %28 = arith.cmpf olt, %26, %27 : vector<16x128xf32>
    %cst_16 = arith.constant 0x7FC00000 : f32
    %29 = vector.broadcast %cst_16 : f32 to vector<16x128xf32>
    %30 = arith.select %28, %20, %29 : vector<16x128xi1>, vector<16x128xf32>
    %31 = vector.broadcast %3 : vector<1x128xf32> to vector<16x128xf32>
    %32 = arith.mulf %31, %25 : vector<16x128xf32>
    %cst_17 = arith.constant dense<0.000000e+00> : vector<16xf32>
    %33 = vector.multi_reduction <add>, %32, %cst_17 [1] : vector<16x128xf32> to vector<16xf32>
    %34 = vector.shape_cast %33 : vector<16xf32> to vector<16x1xf32>
    %35 = tpu.transpose %34, [1, 0] : vector<16x1xf32> -> vector<1x16xf32>
    %c0_18 = arith.constant 0 : index
    %c0_19 = arith.constant 0 : index
    %36 = vector.load %arg8[%c0_18, %c0_19] : memref<1x16xf32, #tpu.memory_space<vmem>>, vector<1x16xf32>
    tpu.vector_store %arg8[%c0_18, %c0_19], %35 {strides = array<i32>} : memref<1x16xf32, #tpu.memory_space<vmem>>, vector<1x16xf32>,
    %37 = vector.broadcast %3 : vector<1x128xf32> to vector<16x128xf32>
    %38 = arith.mulf %37, %30 : vector<16x128xf32>
    %39 = arith.addf %5, %38 : vector<16x128xf32>
    %40 = math.exp %25 : vector<16x128xf32>
    %41 = arith.mulf %0, %40 : vector<16x128xf32>
    %42 = vector.broadcast %3 : vector<1x128xf32> to vector<16x128xf32>
    %43 = arith.mulf %42, %41 : vector<16x128xf32>
    %44 = arith.addf %39, %43 : vector<16x128xf32>
    %c0_20 = arith.constant 0 : index
    %c0_21 = arith.constant 0 : index
    %45 = vector.load %arg7[%c0_20, %c0_21] : memref<16x128xf32, #tpu.memory_space<vmem>>, vector<16x128xf32>
    tpu.vector_store %arg7[%c0_20, %c0_21], %44 {strides = array<i32>} : memref<16x128xf32, #tpu.memory_space<vmem>>, vector<16x128xf32>,
    return
  }
  func.func @transform_0(%arg0: i32) -> (i32, i32) {
    %c0_i32 = arith.constant 0 : i32
    %c0_i32_0 = arith.constant 0 : i32
    return %arg0, %c0_i32 : i32, i32
  }
  func.func @transform_1(%arg0: i32) -> (i32, i32) {
    %c0_i32 = arith.constant 0 : i32
    %c0_i32_0 = arith.constant 0 : i32
    %c0_i32_1 = arith.constant 0 : i32
    return %c0_i32, %c0_i32_0 : i32, i32
  }
  func.func @transform_2(%arg0: i32) -> (i32, i32) {
    %c0_i32 = arith.constant 0 : i32
    %c0_i32_0 = arith.constant 0 : i32
    %c0_i32_1 = arith.constant 0 : i32
    return %c0_i32, %c0_i32_0 : i32, i32
  }
  func.func @transform_3(%arg0: i32) -> (i32, i32) {
    %c0_i32 = arith.constant 0 : i32
    %c0_i32_0 = arith.constant 0 : i32
    %c0_i32_1 = arith.constant 0 : i32
    return %c0_i32, %c0_i32_0 : i32, i32
  }
  func.func @transform_4(%arg0: i32) -> (i32, i32) {
    %c0_i32 = arith.constant 0 : i32
    %c0_i32_0 = arith.constant 0 : i32
    %c0_i32_1 = arith.constant 0 : i32
    return %c0_i32, %c0_i32_0 : i32, i32
  }
  func.func @transform_5(%arg0: i32) -> (i32, i32) {
    %c0_i32 = arith.constant 0 : i32
    %c0_i32_0 = arith.constant 0 : i32
    %c0_i32_1 = arith.constant 0 : i32
    return %c0_i32, %c0_i32_0 : i32, i32
  }
  func.func @transform_6(%arg0: i32) -> (i32, i32) {
    %c0_i32 = arith.constant 0 : i32
    %c0_i32_0 = arith.constant 0 : i32
    return %arg0, %c0_i32 : i32, i32
  }
  func.func @transform_7(%arg0: i32) -> (i32, i32) {
    %c0_i32 = arith.constant 0 : i32
    %c0_i32_0 = arith.constant 0 : i32
    return %c0_i32, %arg0 : i32, i32
  }
}

</mosaic_0001>

<bundles_post_ra>
// kernel: tpu_custom_call.1
= control target key start
LH: loop header
LB: loop body
LE: loop exit
PB: predicated region body
PF: predicated region fallthrough
CT: control target
= control target key end

     0   :  { %13 = vsyncpa [#allocation3], 0  ;;  %s833_s0 = inlined_call_operand.hbm [shape: f32[16,128], index: 0, kind: input, shape index: {}]   ;;  %s834_s1 = inlined_call_operand.vmem [shape: f32[1,128], index: 1, kind: input, shape index: {}]   ;;  %s835_s2 = inlined_call_operand.hbm [shape: bf16[128,128], index: 2, kind: input, shape index: {}]   ;;  %s836_s3 = inlined_call_operand.vmem [shape: f32[1,128], index: 3, kind: input, shape index: {}]   ;;  %s837_s4 = inlined_call_operand.hbm [shape: bf16[128,256], index: 4, kind: input, shape index: {}]   ;;  %s838_s5 = inlined_call_operand.vmem [shape: f32[1,256], index: 5, kind: input, shape index: {}]   ;;  %s839_s6 = inlined_call_operand.hbm [shape: f32[16,128], index: 6, kind: output, shape index: {0}]   ;;  %s840_s7 = inlined_call_operand.hbm [shape: f32[1,16], index: 7, kind: output, shape index: {1}]  }
   0x1   :  { %14 = vsyncpa [#allocation6], 0 }
   0x2   :  { %15 = vsyncpa [#allocation4], 0 }
   0x3   :  { %16 = vsyncpa [#allocation10], 0  ;;  %s678_s24 = smov [#allocation5]   ;;  %s560_s28 = scalar_lea.hbm %s835_s2, 1024 }
   0x4   :  { %s36_s25 = sshll.u32 %s678_s24, 4  ;;  %p561_p0 = scmp.ne.s32.totalorder %s835_s2, %s560_s28  ;;  %s37_s25 = int_to_ptr.vmem [resolvable:$true] %s36_s25 }
   0x5   :  { %p564_p1 = scmp.lt.u32.totalorder %s560_s28, %s835_s2 }
   0x7   :  { %p566_p2 = pnand %p564_p1, %p561_p0 }
   0x9   :  { %569 = shalt.err (!%p566_p2)
}
   0xa   :  { %s570_s10 = scalar_lea.vmem %s37_s25, 1024  ;;  %p575_p4 = scmp.lt.s32.totalorder %s37_s25, %s37_s25 }
   0xb   :  { %p571_p3 = scmp.ne.s32.totalorder %s37_s25, %s570_s10  ;;  %p576_p5 = scmp.lt.s32.totalorder %s570_s10, %s570_s10 }
   0xd   :  { %p577_p6 = por %p576_p5, %p575_p4 }
   0xf   :  { %p578_p7 = pnand %p577_p6, %p571_p3 }
  0x11   :  { %581 = shalt.err (!%p578_p7)
}
  0x12   :  { %s679_s11 = smov 64   ;;  %s680_s12 = smov 4  }
  0x13   :  { %42 = dma.hbm_to_vmem [thread:$0]  %s835_s2, 1024, %s37_s25, [#allocation6], %s679_s11, %s679_s11, %s680_s12  }
  0x14   :  { %s681_s15 = smov [#allocation2]   ;;  %s582_s19 = scalar_lea.hbm %s833_s0, 256 }
  0x15   :  { %s22_s16 = sshll.u32 %s681_s15, 4  ;;  %p583_p8 = scmp.ne.s32.totalorder %s833_s0, %s582_s19  ;;  %s23_s16 = int_to_ptr.vmem [resolvable:$true] %s22_s16 }
  0x16   :  { %p586_p9 = scmp.lt.u32.totalorder %s582_s19, %s833_s0 }
  0x18   :  { %p588_p10 = pnand %p586_p9, %p583_p8 }
  0x1a   :  { %591 = shalt.err (!%p588_p10)
}
  0x1b   :  { %s592_s24 = scalar_lea.vmem %s23_s16, 256  ;;  %p597_p12 = scmp.lt.s32.totalorder %s23_s16, %s23_s16 }
  0x1c   :  { %p593_p11 = scmp.ne.s32.totalorder %s23_s16, %s592_s24  ;;  %p598_p13 = scmp.lt.s32.totalorder %s592_s24, %s592_s24 }
  0x1e   :  { %p599_p0 = por %p598_p13, %p597_p12 }
  0x20   :  { %p600_p1 = pnand %p599_p0, %p593_p11 }
  0x22   :  { %603 = shalt.err (!%p600_p1)
}
  0x23   :  { %s682_s2 = smov 128   ;;  %s683_s25 = smov 8  }
  0x24   :  { %28 = dma.hbm_to_vmem [thread:$0]  %s833_s0, 256, %s23_s16, [#allocation3], %s682_s2, %s682_s2, %s683_s25  }
  0x25   :  { %s684_s28 = smov [#allocation7]   ;;  %s604_s9 = scalar_lea.hbm %s837_s4, 2048 }
  0x26   :  { %s50_s29 = sshll.u32 %s684_s28, 4  ;;  %p605_p2 = scmp.ne.s32.totalorder %s837_s4, %s604_s9  ;;  %s51_s29 = int_to_ptr.vmem [resolvable:$true] %s50_s29 }
  0x27   :  { %p608_p3 = scmp.lt.u32.totalorder %s604_s9, %s837_s4 }
  0x29   :  { %p610_p4 = pnand %p608_p3, %p605_p2 }
  0x2b   :  { %613 = shalt.err (!%p610_p4)
}
  0x2c   :  { %s614_s14 = scalar_lea.vmem %s51_s29, 2048  ;;  %p619_p6 = scmp.lt.s32.totalorder %s51_s29, %s51_s29 }
  0x2d   :  { %p615_p5 = scmp.ne.s32.totalorder %s51_s29, %s614_s14  ;;  %p620_p7 = scmp.lt.s32.totalorder %s614_s14, %s614_s14 }
  0x2f   :  { %p621_p8 = por %p620_p7, %p619_p6 }
  0x31   :  { %p622_p9 = pnand %p621_p8, %p615_p5 }
  0x33   :  { %625 = shalt.err (!%p622_p9)
}
  0x34   :  { %56 = dma.hbm_to_vmem [thread:$0]  %s837_s4, 2048, %s51_s29, [#allocation6], %s682_s2, %s682_s2, %s683_s25  }
  0x35   :  { %670 = dma.done.wait [#allocation3], 256  }
  0x36   :  { %671 = vsyncadd [#allocation3], 4294967040 }
  0x37   :  { %672 = dma.done.wait [#allocation6], 3072  }
  0x38   :  { %673 = vsyncadd [#allocation6], 4294964224  ;;  %v685_v0 = vmov 0.0   ;;  %vm686_vm0 = vmmov 0   ;;  %v520_v1 = vld [vmem:[#allocation5] sm:$0xff]   ;;  %v521_v2 = vld [vmem:[#allocation5 + $0x8] sm:$0xff]   ;;  %v74_v5 = vlaneseq }
  0x39   :  { %488 = vmatprep.subr.bf16.mxu0 %v685_v0  ;;  %504 = vmatprep.mubr.msk.bf16.mxu0 %vm686_vm0, %v685_v0  ;;  %v522_v3 = vld [vmem:[#allocation5 + $0x10] sm:$0xff]   ;;  %v523_v4 = vld [vmem:[#allocation5 + $0x18] sm:$0xff]   ;;  %v528_v6 = vld [vmem:[#allocation7 + $0x4] ss:$8 sps:$4 sm:$0xff]   ;;  %v687_v33 = vmov 0  }
  0x3a   :  { %489 = vmatpush3.bf16.msra.mxu0 %v520_v1  ;;  %v530_v7 = vld [vmem:[#allocation7] ss:$8 sps:$4 sm:$0xff]   ;;  %305 = vmatprep.subr.bf16.mxu1 %v528_v6  ;;  %v531_v8 = vld [vmem:[#allocation7 + $0x14] ss:$8 sps:$4 sm:$0xff]   ;;  %v533_v9 = vld [vmem:[#allocation7 + $0x10] ss:$8 sps:$4 sm:$0xff]  }
  0x3b   :  { %490 = vmatprep.subr.bf16.mxu0 %v685_v0  ;;  %306 = vmatpush1.bf16.msra.mxu1 %v530_v7  ;;  %v772_v10 = vshrl.u32 %v74_v5, 7  ;;  %v534_v11 = vld [vmem:[#allocation7 + $0x24] ss:$8 sps:$4 sm:$0xff]   ;;  %v536_v13 = vld [vmem:[#allocation7 + $0x20] ss:$8 sps:$4 sm:$0xff]   ;;  %v526_v20 = vld [vmem:[#allocation5 + $0x30] sm:$0xff]  }
  0x3c   :  { %307 = vmatprep.subr.bf16.mxu1 %v531_v8  ;;  %v524_v12 = vld [vmem:[#allocation5 + $0x20] sm:$0xff]   ;;  %v537_v15 = vld [vmem:[#allocation7 + $0x34] ss:$8 sps:$4 sm:$0xff]   ;;  %v525_v16 = vld [vmem:[#allocation5 + $0x28] sm:$0xff]   ;;  %337 = vmatprep.mubr.bf16.mxu1 %v687_v33 }
  0x3d   :  { %v775_v14 = vsub.s32 0, %v772_v10  ;;  %v71_v17 = vld [vmem:[%s834_s1] sm:$0x1]  ;;  %v783_v22 = vld [vmem:[#allocation2 + $0x8] sm:$0xff]  ;;  %v540_v27 = vld [vmem:[#allocation7 + $0x44] ss:$8 sps:$4 sm:$0xff]  }
  0x3e   :  { %491 = vmatpush3.bf16.msra.mxu0 %v521_v2  ;;  %v539_v18 = vld [vmem:[#allocation7 + $0x30] ss:$8 sps:$4 sm:$0xff]   ;;  %v542_v28 = vld [vmem:[#allocation7 + $0x40] ss:$8 sps:$4 sm:$0xff]   ;;  %v543_v29 = vld [vmem:[#allocation7 + $0x54] ss:$8 sps:$4 sm:$0xff]  }
  0x3f   :  { %492 = vmatprep.subr.bf16.mxu0 %v685_v0  ;;  %308 = vmatpush1.bf16.msra.mxu1 %v533_v9  ;;  %v77_v19 = vrot.slane %v71_v17, %v775_v14  ;;  %v781_v21 = vld [vmem:[#allocation2] sm:$0xff]  ;;  %v527_v25 = vld [vmem:[#allocation5 + $0x38] sm:$0xff]   ;;  %v546_v31 = vld [vmem:[#allocation7 + $0x64] ss:$8 sps:$4 sm:$0xff]   ;;  %v221_v47 = vsub.s32 1, %v772_v10  ;;  %v72_v50 = vsub.f32 1.0, %v71_v17 }
  0x40   :  { %309 = vmatprep.subr.bf16.mxu1 %v534_v11  ;;  %v545_v30 = vld [vmem:[#allocation7 + $0x50] ss:$8 sps:$4 sm:$0xff]   ;;  %v548_v32 = vld [vmem:[#allocation7 + $0x60] ss:$8 sps:$4 sm:$0xff]   ;;  %v549_v34 = vld [vmem:[#allocation7 + $0x74] ss:$8 sps:$4 sm:$0xff]  }
  0x41   :  { %v786_v23 = vmul.f32 %v77_v19, %v781_v21  ;;  %v789_v24 = vmul.f32 %v77_v19, %v783_v22  ;;  %v551_v35 = vld [vmem:[#allocation7 + $0x70] ss:$8 sps:$4 sm:$0xff]   ;;  %v364_v56 = vrot.slane %v72_v50, %v775_v14 }
  0x42   :  { %493 = vmatpush3.bf16.msra.mxu0 %v522_v3  ;;  %v454_v36 = vld [vmem:[%s836_s3] ss:$0 sm:$0xff]  ;;  %s688_s3 = smov [#allocation8]  }
  0x43   :  { %494 = vmatprep.subr.bf16.mxu0 %v685_v0  ;;  %310 = vmatpush1.bf16.msra.mxu1 %v536_v13  ;;  %v81_v26 = vpack.c.bf16 %v789_v24, %v786_v23  ;;  %v213_v46 = vld [vmem:[%s838_s5] sm:$0x3]  ;;  %s427_s5 = sshll.u32 %s688_s3, 4  ;;  %s428_s5 = int_to_ptr.vmem [resolvable:$true] %s427_s5 }
  0x44   :  { %311 = vmatprep.subr.bf16.mxu1 %v537_v15  ;;  %v218_v48 = vrot.slane %v213_v46, %v775_v14  ;;  %v222_v49 = vrot.slane %v213_v46, %v221_v47  ;;  %s626_s20 = scalar_lea.vmem %s428_s5, 256  ;;  %p631_p11 = scmp.lt.s32.totalorder %s428_s5, %s428_s5 }
  0x45   :  { %p627_p10 = scmp.ne.s32.totalorder %s428_s5, %s626_s20  ;;  %p632_p12 = scmp.lt.s32.totalorder %s626_s20, %s626_s20 }
  0x46   :  { %495 = vmatpush3.bf16.msra.mxu0 %v523_v4 }
  0x47   :  { %496 = vmatprep.subr.bf16.mxu0 %v685_v0  ;;  %312 = vmatpush1.bf16.msra.mxu1 %v539_v18  ;;  %p633_p13 = por %p632_p12, %p631_p11 }
  0x48   :  { %313 = vmatprep.subr.bf16.mxu1 %v540_v27 }
  0x49   :  { %p634_p0 = pnand %p633_p13, %p627_p10 }
  0x4a   :  { %497 = vmatpush3.bf16.msra.mxu0 %v524_v12 }
  0x4b   :  { %498 = vmatprep.subr.bf16.mxu0 %v685_v0  ;;  %314 = vmatpush1.bf16.msra.mxu1 %v542_v28 }
  0x4c   :  { %315 = vmatprep.subr.bf16.mxu1 %v543_v29 }
  0x4e   :  { %499 = vmatpush3.bf16.msra.mxu0 %v525_v16 }
  0x4f   :  { %500 = vmatprep.subr.bf16.mxu0 %v685_v0  ;;  %316 = vmatpush1.bf16.msra.mxu1 %v545_v30 }
  0x50   :  { %317 = vmatprep.subr.bf16.mxu1 %v546_v31 }
  0x52   :  { %501 = vmatpush3.bf16.msra.mxu0 %v526_v20 }
  0x53   :  { %502 = vmatprep.subr.bf16.mxu0 %v685_v0  ;;  %318 = vmatpush1.bf16.msra.mxu1 %v548_v32 }
  0x54   :  { %319 = vmatprep.subr.bf16.mxu1 %v549_v34 }
  0x56   :  { %503 = vmatpush3.bf16.msra.mxu0 %v527_v25 }
  0x57   :  { %320 = vmatpush1.bf16.msra.mxu1 %v551_v35 }
  0x59   :  { %505 = vmatmul.mubr.bf16.vlgmr.msra.gmra.mrb[0].mxu0 %v81_v26 }
 0x12c   :  { %v187_v37 = vpop.f32.mrb[0].mxu0 }
 0x12d   :  { %v188_v38 = vadd.f32 %v454_v36, %v187_v37  ;;  %v506_v39 = vpop.f32.mrb[1].mxu0 }
 0x12e   :  { %v190_v40 = vpop.f32.mrb[2].mxu0 }
 0x12f   :  { %v191_v41 = vadd.f32 %v454_v36, %v190_v40  ;;  %v507_v42 = vpop.f32.mrb[3].mxu0  ;;  %552 = vtanh.f32 %v188_v38 }
 0x131   :  { %554 = vtanh.f32 %v191_v41 }
 0x139   :  { %v553_v43 = vpop.eup %552 }
 0x13b   :  { %v555_v44 = vpop.eup %554 }
 0x13c   :  { %v196_v45 = vpack.c.bf16 %v555_v44, %v553_v43 }
 0x13e   :  { %338 = vmatmul.mubr.bf16.vlgmr.msra.gmra.mrb[0].mxu1 %v196_v45 }
 0x211   :  { %v339_v51 = vpop.f32.mrb[0].mxu1 }
 0x212   :  { %v340_v52 = vadd.f32 %v339_v51, %v218_v48  ;;  %v341_v53 = vpop.f32.mrb[1].mxu1 }
 0x213   :  { %v342_v54 = vadd.f32 %v341_v53, %v222_v49  ;;  %v343_v55 = vpop.f32.mrb[2].mxu1 }
 0x214   :  { %v344_v57 = vadd.f32 %v343_v55, %v218_v48  ;;  %v345_v58 = vpop.f32.mrb[3].mxu1  ;;  %v348_v59 = vand.u32 2147483647, %v340_v52 }
 0x215   :  { %v354_v60 = vand.u32 2147483647, %v342_v54  ;;  %v346_v61 = vadd.f32 %v345_v58, %v222_v49 }
 0x216   :  { %v349_v62 = vand.u32 2147483647, %v344_v57  ;;  %vm350_vm1 = vcmp.lt.f32.partialorder %v348_v59, inf }
 0x217   :  { %vm356_vm2 = vcmp.lt.f32.partialorder %v354_v60, inf  ;;  %v355_v63 = vand.u32 2147483647, %v346_v61  ;;  %v352_v0 = vsel %vm350_vm1, %v340_v52, nan }
 0x218   :  { %v358_v1 = vsel %vm356_vm2, %v342_v54, nan  ;;  %vm351_vm3 = vcmp.lt.f32.partialorder %v349_v62, inf  ;;  %v366_v2 = vmul.f32 %v364_v56, %v352_v0  ;;  %v410_v3 = vmul.f32 1.442695, %v352_v0 }
 0x219   :  { %v406_v4 = vmul.f32 %v364_v56, %v358_v1  ;;  %vm357_vm4 = vcmp.lt.f32.partialorder %v355_v63, inf  ;;  %v353_v5 = vsel %vm351_vm3, %v344_v57, nan }
 0x21a   :  { %v359_v6 = vsel %vm357_vm4, %v346_v61, nan  ;;  %556 = vpow2.f32 %v410_v3  ;;  %368 = vadd.xlane.f32.xlu0 %v366_v2  ;;  %v367_v7 = vmul.f32 %v364_v56, %v353_v5  ;;  %v412_v8 = vmul.f32 1.442695, %v353_v5 }
 0x21b   :  { %v407_v9 = vmul.f32 %v364_v56, %v359_v6  ;;  %v408_v13 = vadd.f32 %v406_v4, %v786_v23 }
 0x21c   :  { %558 = vpow2.f32 %v412_v8 }
 0x21d   :  { %v409_v16 = vadd.f32 %v407_v9, %v789_v24 }
 0x21e   :  { %370 = vadd.xlane.f32.xlu0 %v367_v7 }
 0x224   :  { %v557_v10 = vpop.eup %556 }
 0x225   :  { %v414_v11 = vmul.f32 %v557_v10, %v781_v21 }
 0x226   :  { %v559_v12 = vpop.eup %558 }
 0x227   :  { %v415_v14 = vmul.f32 %v559_v12, %v783_v22  ;;  %v416_v15 = vmul.f32 %v414_v11, %v364_v56 }
 0x229   :  { %v417_v17 = vmul.f32 %v415_v14, %v364_v56  ;;  %v418_v18 = vadd.f32 %v416_v15, %v408_v13 }
 0x22b   :  { %v419_v19 = vadd.f32 %v417_v17, %v409_v16  ;;  %420 = vst [vmem:[#allocation8] sm:$0xff] %v418_v18 }
 0x22d   :  { %421 = vst [vmem:[#allocation8 + $0x8] sm:$0xff] %v419_v19 }
 0x2a7   :  { %v369_v20 = vpop.xlane.xlu0 %368 }
 0x2a8   :  { %372 = vxpose.xlu1.b32.start [1/2] (short) (narrow) %v369_v20, 8 }
 0x2a9   :  { %637 = shalt.err (!%p634_p0)
}
 0x2aa   :  { %s638_s23 = scalar_lea.hbm %s839_s6, 256 }
 0x2ab   :  { %p639_p1 = scmp.ne.s32.totalorder %s839_s6, %s638_s23  ;;  %p642_p2 = scmp.lt.u32.totalorder %s638_s23, %s839_s6 }
 0x2ad   :  { %p644_p3 = pnand %p642_p2, %p639_p1 }
 0x2af   :  { %647 = shalt.err (!%p644_p3)
}
 0x2b0   :  { %433 = dma.vmem_to_hbm [thread:$0]  %s428_s5, 256, %s839_s6, [#allocation4], %s682_s2, %s682_s2, %s683_s25   ;;  %v371_v21 = vpop.xlane.xlu0 %370  ;;  %vm404_vm5 = vcmask 122880  }
 0x2b1   :  { %373 = vxpose.xlu1.b32.end [2/2] (short) (narrow) %v371_v21, 8  ;;  %s689_s8 = smov [#allocation9]  }
 0x2b2   :  { %s440_s9 = sshll.u32 %s689_s8, 4  ;;  %s441_s9 = int_to_ptr.vmem [resolvable:$true] %s440_s9 }
 0x2b3   :  { %s648_s10 = scalar_lea.vmem %s441_s9, 16  ;;  %s652_s11 = scalar_lea.vmem %s441_s9, 32 }
 0x2b4   :  { %p649_p4 = scmp.ne.s32.totalorder %s441_s9, %s648_s10  ;;  %p653_p5 = scmp.lt.s32.totalorder %s441_s9, %s441_s9 }
 0x2b5   :  { %p654_p6 = scmp.lt.s32.totalorder %s652_s11, %s648_s10 }
 0x2b7   :  { %p655_p7 = por %p654_p6, %p653_p5 }
 0x2b9   :  { %p656_p8 = pnand %p655_p7, %p649_p4 }
 0x32d   :  { %v388_v22 = vpop.trf.xlu1 }
 0x32e   :  { %405 = vst.msk [vmem:[#allocation9] sm:$0x1] %vm404_vm5, %v388_v22 }
 0x32f   :  { %659 = shalt.err (!%p656_p8)
}
 0x330   :  { %s660_s6 = scalar_lea.hbm %s840_s7, 16 }
 0x331   :  { %p661_p9 = scmp.ne.s32.totalorder %s840_s7, %s660_s6  ;;  %p664_p10 = scmp.lt.u32.totalorder %s660_s6, %s840_s7 }
 0x333   :  { %p666_p11 = pnand %p664_p10, %p661_p9 }
 0x335   :  { %669 = shalt.err (!%p666_p11)
}
 0x336   :  { %443 = dma.vmem_to_hbm [thread:$0]  %s441_s9, 16, %s840_s7, [#allocation10]  }
 0x337   :  { %674 = dma.done.wait [#allocation4], 256  }
 0x338   :  { %675 = vsyncadd [#allocation4], 4294967040 }
 0x339   :  { %676 = dma.done.wait [#allocation10], 16  }
 0x33a   :  { %677 = vsyncadd [#allocation10], 4294967280 }
 0x33b   :  { %450 = vsyncpa [#allocation3], 1 }
 0x33c   :  { %451 = vsyncpa [#allocation6], 1 }
 0x33d   :  { %452 = vsyncpa [#allocation4], 1 }
 0x33e   :  { %453 = vsyncpa [#allocation10], 1 }

</bundles_post_ra>
